<compile_context>
chip_gen: v6e
topology: v6e:2x2x1
jax: 0.10.0
libtpu: 0.0.40
codegen_flags: <defaults>
</compile_context>

<pallas_src>
import numpy as np
import jax
import jax.numpy as jnp
from jax import lax
from jax.experimental import pallas as pl
from jax.experimental.pallas import tpu as pltpu

FC1_DIMS = 32
FC2_DIMS = 32
OUT_DIMS = 2
LANES = 128
MAX_TILE_ROWS = 2048          # 2048 * 128 * 4B = 1 MiB per pipelined step (f32)


def _round_up(x, m):
    return (x + m - 1) // m * m


def _hypergen_kernel(data_ref, rstart_ref, rend_ref, invc_ref,
                     w1t_ref, b1_ref, w2_ref, b2_ref, w3t_ref, b3_ref,
                     out_ref, acc_ref):
    i = pl.program_id(0)
    tile_rows = data_ref.shape[0]
    seg_pad = acc_ref.shape[1]

    @pl.when(i == 0)
    def _():
        acc_ref[...] = jnp.zeros_like(acc_ref)

    # ---- streaming phase: per-row sums + segment-masked accumulation ------
    # Sums accumulate in f32 regardless of the (possibly narrower) source dtype.
    row_sums = jnp.sum(data_ref[...].astype(jnp.float32), axis=1,
                       keepdims=True)                              # (TR, 1)
    row_idx = (lax.broadcasted_iota(jnp.int32, (tile_rows, seg_pad), 0)
               + i * tile_rows)                                    # global row id
    in_seg = (row_idx >= rstart_ref[...]) & (row_idx < rend_ref[...])
    acc_ref[...] += jnp.sum(jnp.where(in_seg, row_sums, 0.0),
                            axis=0, keepdims=True)                 # (1, SEG_PAD)

    # ---- epilogue: tiny 3-layer MLP on VPU/XLU only (no M=1 MXU matmuls) ---
    @pl.when(i == pl.num_programs(0) - 1)
    def _():
        means = acc_ref[...] * invc_ref[...]                       # (1, SEG_PAD)
        h1 = jnp.sum(w1t_ref[...] * means, axis=1, keepdims=True) + b1_ref[...]
        h1 = jnp.maximum(h1, 0.0)                                  # (FC1, 1)
        h2 = jnp.sum(h1 * w2_ref[...], axis=0, keepdims=True) + b2_ref[...]
        h2 = jnp.maximum(h2, 0.0)                                  # (1, FC2)
        out_ref[...] = (jnp.sum(w3t_ref[...] * h2, axis=1, keepdims=True)
                        + b3_ref[...])                             # (OUT, 1)


def init_params(key, in_dim):
    """PyTorch-Linear-style init: U(-1/sqrt(fan_in), 1/sqrt(fan_in)).
    Weights stored as (in, out) so references compute x @ W + b."""
    ks = jax.random.split(key, 6)

    def lin(kw, kb, fan_in, fan_out):
        bound = 1.0 / np.sqrt(fan_in)
        w = jax.random.uniform(kw, (fan_in, fan_out), jnp.float32, -bound, bound)
        b = jax.random.uniform(kb, (1, fan_out), jnp.float32, -bound, bound)
        return w, b

    w1, b1 = lin(ks[0], ks[1], in_dim, FC1_DIMS)
    w2, b2 = lin(ks[2], ks[3], FC1_DIMS, FC2_DIMS)
    w3, b3 = lin(ks[4], ks[5], FC2_DIMS, OUT_DIMS)
    return dict(w1=w1, b1=b1, w2=w2, b2=b2, w3=w3, b3=b3)


def hypergen_forward(gradients, weights, params):
    """Pallas implementation of HyperparameterGenerator.forward."""
    tensors = list(gradients) + list(weights)
    n_seg = len(tensors)                                  # 2L
    seg_pad = max(LANES, _round_up(n_seg, LANES))

    # Keep the source dtype in the slab (halves HBM bytes for bf16 inputs).
    dt = jnp.result_type(*[t.dtype for t in tensors])
    if not jnp.issubdtype(dt, jnp.floating):
        dt = jnp.float32

    # Dense 128-lane packing: each tensor padded only to the next 128 multiple.
    chunks, counts, row_starts = [], [], []
    r = 0
    for t in tensors:
        f = jnp.ravel(t).astype(dt)
        n = int(f.shape[0])
        rows = -(-n // LANES)
        f = jnp.pad(f, (0, rows * LANES - n))
        chunks.append(f.reshape(rows, LANES))
        counts.append(n)
        row_starts.append(r)
        r += rows
    total_rows = r
    tile_rows = min(MAX_TILE_ROWS, _round_up(total_rows, 8))
    rows_pad = _round_up(total_rows, tile_rows)
    if rows_pad > total_rows:
        chunks.append(jnp.zeros((rows_pad - total_rows, LANES), dt))
    data = jnp.concatenate(chunks, axis=0)                # (rows_pad, 128)

    # Static per-segment metadata: [start, end) row range and 1/count.
    starts = np.full((1, seg_pad), rows_pad, np.int32)
    ends = np.full((1, seg_pad), rows_pad, np.int32)
    invc = np.zeros((1, seg_pad), np.float32)
    for j in range(n_seg):
        starts[0, j] = row_starts[j]
        ends[0, j] = row_starts[j] + (-(-counts[j] // LANES))
        invc[0, j] = 1.0 / counts[j]

    # MLP parameters rearranged for broadcast-multiply + reduce (no MXU).
    w1t = jnp.zeros((FC1_DIMS, seg_pad), jnp.float32).at[:, :n_seg].set(
        params["w1"].T.astype(jnp.float32))
    b1c = params["b1"].reshape(FC1_DIMS, 1).astype(jnp.float32)
    w2 = params["w2"].astype(jnp.float32)
    b2r = params["b2"].reshape(1, FC2_DIMS).astype(jnp.float32)
    w3t = params["w3"].T.astype(jnp.float32)
    b3c = params["b3"].reshape(OUT_DIMS, 1).astype(jnp.float32)

    num_tiles = rows_pad // tile_rows
    const = lambda i: (0, 0)

    out = pl.pallas_call(
        _hypergen_kernel,
        out_shape=jax.ShapeDtypeStruct((OUT_DIMS, 1), jnp.float32),
        grid_spec=pltpu.PrefetchScalarGridSpec(
            num_scalar_prefetch=0,
            grid=(num_tiles,),
            in_specs=[
                pl.BlockSpec((tile_rows, LANES), lambda i: (i, 0)),  # data
                pl.BlockSpec((1, seg_pad), const),                   # starts
                pl.BlockSpec((1, seg_pad), const),                   # ends
                pl.BlockSpec((1, seg_pad), const),                   # 1/count
                pl.BlockSpec((FC1_DIMS, seg_pad), const),            # w1^T (padded)
                pl.BlockSpec((FC1_DIMS, 1), const),                  # b1 column
                pl.BlockSpec((FC1_DIMS, FC2_DIMS), const),           # w2
                pl.BlockSpec((1, FC2_DIMS), const),                  # b2 row
                pl.BlockSpec((OUT_DIMS, FC2_DIMS), const),           # w3^T
                pl.BlockSpec((OUT_DIMS, 1), const),                  # b3 column
            ],
            out_specs=pl.BlockSpec((OUT_DIMS, 1), const),
            scratch_shapes=[pltpu.VMEM((1, seg_pad), jnp.float32)],
        ),
        compiler_params=pltpu.CompilerParams(
            dimension_semantics=("arbitrary",),
            vmem_limit_bytes=32 * 1024 * 1024),
    )(data, jnp.asarray(starts), jnp.asarray(ends), jnp.asarray(invc),
      w1t, b1c, w2, b2r, w3t, b3c)

    alpha, beta = out[0, 0], out[1, 0]
    return alpha, beta


def ref_forward(gradients, weights, params):
    """Pure-JAX reference mirroring the PyTorch module."""
    x = jnp.concatenate([jnp.stack([jnp.mean(g) for g in gradients]),
                         jnp.stack([jnp.mean(w) for w in weights])])[None, :]
    x = x.astype(jnp.float32)
    h1 = jax.nn.relu(x @ params["w1"] + params["b1"])
    h2 = jax.nn.relu(h1 @ params["w2"] + params["b2"])
    o = h2 @ params["w3"] + params["b3"]
    return o[0, 0], o[0, 1]


if __name__ == "__main__":
    key = jax.random.PRNGKey(0)
    k_params, k_data = jax.random.split(key)

    # Small synthetic "model" parameter shapes (e.g. a tiny conv+fc net).
    param_shapes = [(4, 4, 3, 3), (4,), (2, 4, 16, 16)]
    ks = jax.random.split(k_data, 2 * len(param_shapes))
    gradients = [0.01 * jax.random.normal(ks[i], s, jnp.float32)
                 for i, s in enumerate(param_shapes)]
    weights = [jax.random.normal(ks[len(param_shapes) + i], s, jnp.float32)
               for i, s in enumerate(param_shapes)]

    in_dim = 2 * len(param_shapes)          # inputs.size(1) in the torch code
    params = init_params(k_params, in_dim)

    alpha, beta = hypergen_forward(gradients, weights, params)
    jax.block_until_ready((alpha, beta))

    ref_alpha, ref_beta = ref_forward(gradients, weights, params)
    assert np.allclose(np.asarray(alpha), np.asarray(ref_alpha), rtol=1e-5, atol=1e-5)
    assert np.allclose(np.asarray(beta), np.asarray(ref_beta), rtol=1e-5, atol=1e-5)

    print("KERNEL_OK")
</pallas_src>

<mosaic_0001>
module attributes {stable_mosaic.version = 11 : i64} {
  func.func @_hypergen_kernel(%arg0: i32, %arg1: memref<40x128xf32, #tpu.memory_space<vmem>>, %arg2: memref<1x128xi32, #tpu.memory_space<vmem>>, %arg3: memref<1x128xi32, #tpu.memory_space<vmem>>, %arg4: memref<1x128xf32, #tpu.memory_space<vmem>>, %arg5: memref<32x128xf32, #tpu.memory_space<vmem>>, %arg6: memref<32x1xf32, #tpu.memory_space<vmem>>, %arg7: memref<32x32xf32, #tpu.memory_space<vmem>>, %arg8: memref<1x32xf32, #tpu.memory_space<vmem>>, %arg9: memref<2x32xf32, #tpu.memory_space<vmem>>, %arg10: memref<2x1xf32, #tpu.memory_space<vmem>>, %arg11: memref<2x1xf32, #tpu.memory_space<vmem>>, %arg12: memref<1x128xf32, #tpu.memory_space<vmem>>) attributes {dimension_semantics = [#tpu.dimension_semantics<arbitrary>], iteration_bounds = array<i64: 1>, scalar_prefetch = 0 : i64, scratch_operands = 1 : i64, tpu.core_type = #tpu.core_type<tc>, window_params = [{transform_indices = @transform_0, window_bounds = array<i64: 40, 128>}, {pipeline_mode = #tpu.pipeline_mode<synchronous>, transform_indices = @transform_1, window_bounds = array<i64: 1, 128>}, {pipeline_mode = #tpu.pipeline_mode<synchronous>, transform_indices = @transform_2, window_bounds = array<i64: 1, 128>}, {pipeline_mode = #tpu.pipeline_mode<synchronous>, transform_indices = @transform_3, window_bounds = array<i64: 1, 128>}, {pipeline_mode = #tpu.pipeline_mode<synchronous>, transform_indices = @transform_4, window_bounds = array<i64: 32, 128>}, {pipeline_mode = #tpu.pipeline_mode<synchronous>, transform_indices = @transform_5, window_bounds = array<i64: 32, 1>}, {pipeline_mode = #tpu.pipeline_mode<synchronous>, transform_indices = @transform_6, window_bounds = array<i64: 32, 32>}, {pipeline_mode = #tpu.pipeline_mode<synchronous>, transform_indices = @transform_7, window_bounds = array<i64: 1, 32>}, {pipeline_mode = #tpu.pipeline_mode<synchronous>, transform_indices = @transform_8, window_bounds = array<i64: 2, 32>}, {pipeline_mode = #tpu.pipeline_mode<synchronous>, transform_indices = @transform_9, window_bounds = array<i64: 2, 1>}, {pipeline_mode = #tpu.pipeline_mode<synchronous>, transform_indices = @transform_10, window_bounds = array<i64: 2, 1>}]} {
    %c0_i32 = arith.constant 0 : i32
    %0 = arith.cmpi eq, %arg0, %c0_i32 : i32
    %1 = arith.extui %0 : i1 to i32
    %c0_i32_0 = arith.constant 0 : i32
    %2 = arith.cmpi ne, %1, %c0_i32_0 : i32
    scf.if %2 {
      %cst_14 = arith.constant 0.000000e+00 : f32
      %29 = vector.broadcast %cst_14 : f32 to vector<1x128xf32>
      %c0_15 = arith.constant 0 : index
      %c0_16 = arith.constant 0 : index
      %30 = vector.load %arg12[%c0_15, %c0_16] : memref<1x128xf32, #tpu.memory_space<vmem>>, vector<1x128xf32>
      tpu.vector_store %arg12[%c0_15, %c0_16], %29 {strides = array<i32>} : memref<1x128xf32, #tpu.memory_space<vmem>>, vector<1x128xf32>,
    } else {
    }
    %c0 = arith.constant 0 : index
    %c0_1 = arith.constant 0 : index
    %3 = vector.load %arg1[%c0, %c0_1] : memref<40x128xf32, #tpu.memory_space<vmem>>, vector<40x128xf32>
    %cst = arith.constant dense<0.000000e+00> : vector<40xf32>
    %4 = vector.multi_reduction <add>, %3, %cst [1] : vector<40x128xf32> to vector<40xf32>
    %5 = vector.shape_cast %4 : vector<40xf32> to vector<40x1xf32>
    %6 = tpu.iota {dimensions = array<i32: 0>} : vector<40x128xi32>
    %c40_i32 = arith.constant 40 : i32
    %7 = arith.muli %arg0, %c40_i32 : i32
    %8 = vector.broadcast %7 : i32 to vector<40x128xi32>
    %9 = arith.addi %6, %8 : vector<40x128xi32>
    %c0_2 = arith.constant 0 : index
    %c0_3 = arith.constant 0 : index
    %10 = vector.load %arg2[%c0_2, %c0_3] : memref<1x128xi32, #tpu.memory_space<vmem>>, vector<1x128xi32>
    %11 = vector.broadcast %10 : vector<1x128xi32> to vector<40x128xi32>
    %12 = arith.cmpi sge, %9, %11 : vector<40x128xi32>
    %c0_4 = arith.constant 0 : index
    %c0_5 = arith.constant 0 : index
    %13 = vector.load %arg3[%c0_4, %c0_5] : memref<1x128xi32, #tpu.memory_space<vmem>>, vector<1x128xi32>
    %14 = vector.broadcast %13 : vector<1x128xi32> to vector<40x128xi32>
    %15 = arith.cmpi slt, %9, %14 : vector<40x128xi32>
    %16 = arith.andi %12, %15 : vector<40x128xi1>
    %c0_6 = arith.constant 0 : index
    %c0_7 = arith.constant 0 : index
    %17 = vector.load %arg12[%c0_6, %c0_7] : memref<1x128xf32, #tpu.memory_space<vmem>>, vector<1x128xf32>
    %cst_8 = arith.constant 0.000000e+00 : f32
    %18 = vector.shape_cast %5 : vector<40x1xf32> to vector<40x1xf32>
    %19 = vector.broadcast %18 : vector<40x1xf32> to vector<40x128xf32>
    %20 = vector.broadcast %cst_8 : f32 to vector<40x128xf32>
    %21 = arith.select %16, %19, %20 : vector<40x128xi1>, vector<40x128xf32>
    %cst_9 = arith.constant dense<0.000000e+00> : vector<128xf32>
    %22 = vector.multi_reduction <add>, %21, %cst_9 [0] : vector<40x128xf32> to vector<128xf32>
    %23 = vector.shape_cast %22 : vector<128xf32> to vector<1x128xf32>
    %24 = arith.addf %17, %23 : vector<1x128xf32>
    %c0_10 = arith.constant 0 : index
    %c0_11 = arith.constant 0 : index
    %25 = vector.load %arg12[%c0_10, %c0_11] : memref<1x128xf32, #tpu.memory_space<vmem>>, vector<1x128xf32>
    tpu.vector_store %arg12[%c0_10, %c0_11], %24 {strides = array<i32>} : memref<1x128xf32, #tpu.memory_space<vmem>>, vector<1x128xf32>,
    %c0_i32_12 = arith.constant 0 : i32
    %26 = arith.cmpi eq, %arg0, %c0_i32_12 : i32
    %27 = arith.extui %26 : i1 to i32
    %c0_i32_13 = arith.constant 0 : i32
    %28 = arith.cmpi ne, %27, %c0_i32_13 : i32
    scf.if %28 {
      %c0_14 = arith.constant 0 : index
      %c0_15 = arith.constant 0 : index
      %29 = vector.load %arg12[%c0_14, %c0_15] : memref<1x128xf32, #tpu.memory_space<vmem>>, vector<1x128xf32>
      %c0_16 = arith.constant 0 : index
      %c0_17 = arith.constant 0 : index
      %30 = vector.load %arg4[%c0_16, %c0_17] : memref<1x128xf32, #tpu.memory_space<vmem>>, vector<1x128xf32>
      %31 = arith.mulf %29, %30 : vector<1x128xf32>
      %c0_18 = arith.constant 0 : index
      %c0_19 = arith.constant 0 : index
      %32 = vector.load %arg5[%c0_18, %c0_19] : memref<32x128xf32, #tpu.memory_space<vmem>>, vector<32x128xf32>
      %33 = vector.broadcast %31 : vector<1x128xf32> to vector<32x128xf32>
      %34 = arith.mulf %32, %33 : vector<32x128xf32>
      %cst_20 = arith.constant dense<0.000000e+00> : vector<32xf32>
      %35 = vector.multi_reduction <add>, %34, %cst_20 [1] : vector<32x128xf32> to vector<32xf32>
      %36 = vector.shape_cast %35 : vector<32xf32> to vector<32x1xf32>
      %c0_21 = arith.constant 0 : index
      %c0_22 = arith.constant 0 : index
      %37 = vector.load %arg6[%c0_21, %c0_22] : memref<32x1xf32, #tpu.memory_space<vmem>>, vector<32x1xf32>
      %38 = arith.addf %36, %37 : vector<32x1xf32>
      %cst_23 = arith.constant 0.000000e+00 : f32
      %39 = vector.broadcast %cst_23 : f32 to vector<32x1xf32>
      %40 = arith.maximumf %38, %39 : vector<32x1xf32>
      %c0_24 = arith.constant 0 : index
      %c0_25 = arith.constant 0 : index
      %41 = vector.load %arg7[%c0_24, %c0_25] : memref<32x32xf32, #tpu.memory_space<vmem>>, vector<32x32xf32>
      %42 = vector.broadcast %40 : vector<32x1xf32> to vector<32x32xf32>
      %43 = arith.mulf %42, %41 : vector<32x32xf32>
      %cst_26 = arith.constant dense<0.000000e+00> : vector<32xf32>
      %44 = vector.multi_reduction <add>, %43, %cst_26 [0] : vector<32x32xf32> to vector<32xf32>
      %45 = vector.shape_cast %44 : vector<32xf32> to vector<1x32xf32>
      %c0_27 = arith.constant 0 : index
      %c0_28 = arith.constant 0 : index
      %46 = vector.load %arg8[%c0_27, %c0_28] : memref<1x32xf32, #tpu.memory_space<vmem>>, vector<1x32xf32>
      %47 = arith.addf %45, %46 : vector<1x32xf32>
      %cst_29 = arith.constant 0.000000e+00 : f32
      %48 = vector.broadcast %cst_29 : f32 to vector<1x32xf32>
      %49 = arith.maximumf %47, %48 : vector<1x32xf32>
      %c0_30 = arith.constant 0 : index
      %c0_31 = arith.constant 0 : index
      %50 = vector.load %arg9[%c0_30, %c0_31] : memref<2x32xf32, #tpu.memory_space<vmem>>, vector<2x32xf32>
      %51 = vector.broadcast %49 : vector<1x32xf32> to vector<2x32xf32>
      %52 = arith.mulf %50, %51 : vector<2x32xf32>
      %cst_32 = arith.constant dense<0.000000e+00> : vector<2xf32>
      %53 = vector.multi_reduction <add>, %52, %cst_32 [1] : vector<2x32xf32> to vector<2xf32>
      %54 = vector.shape_cast %53 : vector<2xf32> to vector<2x1xf32>
      %c0_33 = arith.constant 0 : index
      %c0_34 = arith.constant 0 : index
      %55 = vector.load %arg10[%c0_33, %c0_34] : memref<2x1xf32, #tpu.memory_space<vmem>>, vector<2x1xf32>
      %56 = arith.addf %54, %55 : vector<2x1xf32>
      %c0_35 = arith.constant 0 : index
      %c0_36 = arith.constant 0 : index
      %57 = vector.load %arg11[%c0_35, %c0_36] : memref<2x1xf32, #tpu.memory_space<vmem>>, vector<2x1xf32>
      tpu.vector_store %arg11[%c0_35, %c0_36], %56 {strides = array<i32>} : memref<2x1xf32, #tpu.memory_space<vmem>>, vector<2x1xf32>,
    } else {
    }
    return
  }
  func.func @transform_0(%arg0: i32) -> (i32, i32) {
    %c0_i32 = arith.constant 0 : i32
    %c0_i32_0 = arith.constant 0 : i32
    return %arg0, %c0_i32 : i32, i32
  }
  func.func @transform_1(%arg0: i32) -> (i32, i32) {
    %c0_i32 = arith.constant 0 : i32
    %c0_i32_0 = arith.constant 0 : i32
    %c0_i32_1 = arith.constant 0 : i32
    return %c0_i32, %c0_i32_0 : i32, i32
  }
  func.func @transform_2(%arg0: i32) -> (i32, i32) {
    %c0_i32 = arith.constant 0 : i32
    %c0_i32_0 = arith.constant 0 : i32
    %c0_i32_1 = arith.constant 0 : i32
    return %c0_i32, %c0_i32_0 : i32, i32
  }
  func.func @transform_3(%arg0: i32) -> (i32, i32) {
    %c0_i32 = arith.constant 0 : i32
    %c0_i32_0 = arith.constant 0 : i32
    %c0_i32_1 = arith.constant 0 : i32
    return %c0_i32, %c0_i32_0 : i32, i32
  }
  func.func @transform_4(%arg0: i32) -> (i32, i32) {
    %c0_i32 = arith.constant 0 : i32
    %c0_i32_0 = arith.constant 0 : i32
    %c0_i32_1 = arith.constant 0 : i32
    return %c0_i32, %c0_i32_0 : i32, i32
  }
  func.func @transform_5(%arg0: i32) -> (i32, i32) {
    %c0_i32 = arith.constant 0 : i32
    %c0_i32_0 = arith.constant 0 : i32
    %c0_i32_1 = arith.constant 0 : i32
    return %c0_i32, %c0_i32_0 : i32, i32
  }
  func.func @transform_6(%arg0: i32) -> (i32, i32) {
    %c0_i32 = arith.constant 0 : i32
    %c0_i32_0 = arith.constant 0 : i32
    %c0_i32_1 = arith.constant 0 : i32
    return %c0_i32, %c0_i32_0 : i32, i32
  }
  func.func @transform_7(%arg0: i32) -> (i32, i32) {
    %c0_i32 = arith.constant 0 : i32
    %c0_i32_0 = arith.constant 0 : i32
    %c0_i32_1 = arith.constant 0 : i32
    return %c0_i32, %c0_i32_0 : i32, i32
  }
  func.func @transform_8(%arg0: i32) -> (i32, i32) {
    %c0_i32 = arith.constant 0 : i32
    %c0_i32_0 = arith.constant 0 : i32
    %c0_i32_1 = arith.constant 0 : i32
    return %c0_i32, %c0_i32_0 : i32, i32
  }
  func.func @transform_9(%arg0: i32) -> (i32, i32) {
    %c0_i32 = arith.constant 0 : i32
    %c0_i32_0 = arith.constant 0 : i32
    %c0_i32_1 = arith.constant 0 : i32
    return %c0_i32, %c0_i32_0 : i32, i32
  }
  func.func @transform_10(%arg0: i32) -> (i32, i32) {
    %c0_i32 = arith.constant 0 : i32
    %c0_i32_0 = arith.constant 0 : i32
    %c0_i32_1 = arith.constant 0 : i32
    return %c0_i32, %c0_i32_0 : i32, i32
  }
}

</mosaic_0001>

<bundles_post_ra>
// kernel: tpu_custom_call.1
= control target key start
LH: loop header
LB: loop body
LE: loop exit
PB: predicated region body
PF: predicated region fallthrough
CT: control target
= control target key end

     0   :  { %15 = vsyncpa [#allocation4], 0  ;;  %s423_s0 = inlined_call_operand.hbm [shape: f32[40,128], index: 0, kind: input, shape index: {}]   ;;  %s424_s1 = inlined_call_operand.vmem [shape: s32[1,128], index: 1, kind: input, shape index: {}]   ;;  %s425_s2 = inlined_call_operand.vmem [shape: s32[1,128], index: 2, kind: input, shape index: {}]   ;;  %s426_s3 = inlined_call_operand.vmem [shape: f32[1,128], index: 3, kind: input, shape index: {}]   ;;  %s427_s4 = inlined_call_operand.vmem [shape: f32[32,128], index: 4, kind: input, shape index: {}]   ;;  %s428_s5 = inlined_call_operand.vmem [shape: f32[32,1], index: 5, kind: input, shape index: {}]   ;;  %s429_s6 = inlined_call_operand.hbm [shape: f32[32,32], index: 6, kind: input, shape index: {}]   ;;  %s430_s7 = inlined_call_operand.vmem [shape: f32[1,32], index: 7, kind: input, shape index: {}]   ;;  %s431_s8 = inlined_call_operand.vmem [shape: f32[2,32], index: 8, kind: input, shape index: {}]   ;;  %s432_s9 = inlined_call_operand.vmem [shape: f32[2,1], index: 9, kind: input, shape index: {}]   ;;  %s433_s10 = inlined_call_operand.vmem [shape: f32[2,1], index: 10, kind: output, shape index: {}]  }
   0x1   :  { %16 = vsyncpa [#allocation6], 0  ;;  %s298_s13 = smov [#allocation3]  }
   0x2   :  { %s22_s14 = sshll.u32 %s298_s13, 4  ;;  %s23_s14 = int_to_ptr.vmem [resolvable:$true] %s22_s14 }
   0x3   :  { %s262_s15 = scalar_lea.vmem %s23_s14, 640  ;;  %p267_p1 = scmp.lt.s32.totalorder %s23_s14, %s23_s14 }
   0x4   :  { %p263_p0 = scmp.ne.s32.totalorder %s23_s14, %s262_s15  ;;  %p268_p2 = scmp.lt.s32.totalorder %s262_s15, %s262_s15 }
   0x6   :  { %p269_p3 = por %p268_p2, %p267_p1 }
   0x8   :  { %p270_p4 = pnand %p269_p3, %p263_p0 }
   0xa   :  { %273 = shalt.err (!%p270_p4)
}
   0xb   :  { %s299_s16 = smov 128   ;;  %s300_s17 = smov 8  }
   0xc   :  { %28 = dma.hbm_to_vmem [thread:$0]  %s423_s0, 640, %s23_s14, [#allocation4], %s299_s16, %s299_s16, %s300_s17  }
   0xd   :  { %s301_s20 = smov [#allocation5]  }
   0xe   :  { %s44_s21 = sshll.u32 %s301_s20, 4  ;;  %s45_s21 = int_to_ptr.vmem [resolvable:$true] %s44_s21 }
   0xf   :  { %s282_s22 = scalar_lea.vmem %s45_s21, 512  ;;  %p287_p6 = scmp.lt.s32.totalorder %s45_s21, %s45_s21 }
  0x10   :  { %p283_p5 = scmp.ne.s32.totalorder %s45_s21, %s282_s22  ;;  %p288_p7 = scmp.lt.s32.totalorder %s282_s22, %s282_s22 }
  0x12   :  { %p289_p8 = por %p288_p7, %p287_p6 }
  0x14   :  { %p290_p9 = pnand %p289_p8, %p283_p5 }
  0x16   :  { %293 = shalt.err (!%p290_p9)
}
  0x17   :  { %50 = dma.hbm_to_vmem [thread:$0]  %s429_s6, 512, %s45_s21, [#allocation6], %s299_s16, %s299_s16, %s300_s17  }
  0x18   :  { %294 = dma.done.wait [#allocation4], 640  }
  0x19   :  { %295 = vsyncadd [#allocation4], 4294966656 }
  0x1a   :  { %296 = dma.done.wait [#allocation6], 512  }
  0x1b   :  { %297 = vsyncadd [#allocation6], 4294966784  ;;  %v68_v0 = vld [vmem:[#allocation3] sm:$0xff]  ;;  %v70_v1 = vld [vmem:[#allocation3 + $0x10] sm:$0xff]  ;;  %v302_v5 = vmov 0.0   ;;  %v83_v6 = vlaneseq  ;;  %v303_v49 = vmov 0  }
  0x1c   :  { %73 = vadd.xlane.f32.xlu0 %v68_v0  ;;  %77 = vadd.xlane.f32.xlu1 %v70_v1  ;;  %v69_v2 = vld [vmem:[#allocation3 + $0x8] sm:$0xff]  ;;  %v71_v3 = vld [vmem:[#allocation3 + $0x18] sm:$0xff]  ;;  %v72_v4 = vld [vmem:[#allocation3 + $0x20] sm:$0xff]  ;;  %67 = vst [vmem:[#allocation2] sm:$0x1] %v302_v5  ;;  %vm207_vm15 = vcmask 261120  }
  0x1d   :  { %v365_v7 = vshrl.u32 %v83_v6, 7  ;;  %v244_v8 = vld [vmem:[%s424_s1] ss:$0 sm:$0xff]  ;;  %v146_v40 = vld [vmem:[%s427_s4 + $0x8] sm:$0xff]  ;;  %v148_v45 = vld [vmem:[%s427_s4 + $0x18] sm:$0xff]  ;;  %253 = vset.pattern.permute.xlu0 %v303_v49  ;;  %252 = vset.pattern.permute.xlu1 %v303_v49 }
  0x1e   :  { %v245_v9 = vld [vmem:[%s425_s2] ss:$0 sm:$0xff]  ;;  %v147_v46 = vld [vmem:[%s427_s4 + $0x10] sm:$0xff]  ;;  %v168_v50 = vld [vmem:[%s428_s5 + $0x8] sm:$0xff] }
  0x1f   :  { %v85_v10 = vadd.s32 8, %v365_v7  ;;  %v86_v11 = vadd.s32 16, %v365_v7  ;;  %v87_v12 = vadd.s32 24, %v365_v7  ;;  %vm101_vm0 = vcmp.ge.s32.totalorder %v365_v7, %v244_v8  ;;  %v143_v36 = vld [vmem:[%s426_s3] sm:$0x1]  ;;  %v169_v56 = vld [vmem:[%s428_s5 + $0x10] sm:$0xff] }
  0x20   :  { %75 = vadd.xlane.f32.xlu0 %v69_v2  ;;  %79 = vadd.xlane.f32.xlu1 %v71_v3  ;;  %vm111_vm1 = vcmp.lt.s32.totalorder %v365_v7, %v245_v9  ;;  %v88_v13 = vadd.s32 32, %v365_v7  ;;  %v152_v37 = vsub.s32 0, %v365_v7  ;;  %v145_v41 = vld [vmem:[%s427_s4] sm:$0xff]  ;;  %v170_v59 = vld [vmem:[%s428_s5 + $0x18] sm:$0xff]  ;;  %v179_v3 = vld [vmem:[#allocation5] sm:$0xff] }
  0x21   :  { %vm102_vm2 = vcmp.ge.s32.totalorder %v85_v10, %v244_v8  ;;  %vm112_vm3 = vcmp.lt.s32.totalorder %v85_v10, %v245_v9  ;;  %vm103_vm4 = vcmp.ge.s32.totalorder %v86_v11, %v244_v8  ;;  %vm113_vm5 = vcmp.lt.s32.totalorder %v86_v11, %v245_v9  ;;  %vm116_vm6 = vmand %vm101_vm0, %vm111_vm1  ;;  %v167_v51 = vld [vmem:[%s428_s5] sm:$0xff]  ;;  %v180_v2 = vld [vmem:[#allocation5 + $0x8] sm:$0xff] }
  0x22   :  { %vm104_vm7 = vcmp.ge.s32.totalorder %v87_v12, %v244_v8  ;;  %vm114_vm8 = vcmp.lt.s32.totalorder %v87_v12, %v245_v9  ;;  %vm117_vm9 = vmand %vm102_vm2, %vm112_vm3  ;;  %vm105_vm11 = vcmp.ge.s32.totalorder %v88_v13, %v244_v8  ;;  %vm115_vm12 = vcmp.lt.s32.totalorder %v88_v13, %v245_v9  ;;  %v181_v9 = vld [vmem:[#allocation5 + $0x10] sm:$0xff] }
  0x23   :  { %vm118_vm10 = vmand %vm103_vm4, %vm113_vm5  ;;  %v121_v33 = vld [vmem:[#allocation2] sm:$0x1]  ;;  %vm230_vm0 = vcmask 254976   ;;  %vm236_vm1 = vcmask 1024  }
  0x24   :  { %81 = vadd.xlane.f32.xlu0 %v72_v4  ;;  %vm119_vm13 = vmand %vm104_vm7, %vm114_vm8 }
  0x25   :  { %vm120_vm14 = vmand %vm105_vm11, %vm115_vm12 }
  0xa5   :  { %v74_v14 = vpop.xlane.xlu0 %73  ;;  %v78_v15 = vpop.xlane.xlu1 %77 }
  0xa6   :  { %v122_v18 = vsel %vm116_vm6, %v74_v14, 0.0  ;;  %v124_v21 = vsel %vm118_vm10, %v78_v15, 0.0  ;;  %v182_v14 = vld [vmem:[#allocation5 + $0x18] sm:$0xff] }
  0xa9   :  { %v76_v16 = vpop.xlane.xlu0 %75  ;;  %v80_v17 = vpop.xlane.xlu1 %79 }
  0xaa   :  { %v123_v19 = vsel %vm117_vm9, %v76_v16, 0.0  ;;  %v125_v22 = vsel %vm119_vm13, %v80_v17, 0.0 }
  0xab   :  { %v127_v20 = vadd.f32 %v123_v19, %v122_v18 }
  0xad   :  { %v128_v23 = vadd.f32 %v127_v20, %v124_v21  ;;  %v82_v24 = vpop.xlane.xlu0 %81 }
  0xae   :  { %v126_v25 = vsel %vm120_vm14, %v82_v24, 0.0 }
  0xaf   :  { %v129_v26 = vadd.f32 %v128_v23, %v125_v22 }
  0xb1   :  { %v130_v27 = vadd.f32 %v129_v26, %v126_v25 }
  0xb3   :  { %v131_v28 = vrot.slane %v130_v27, 4 }
  0xb5   :  { %v132_v29 = vadd.f32 %v131_v28, %v130_v27  ;;  %v221_v27 = vld [vmem:[%s430_s7] sm:$0x1] }
  0xb7   :  { %v133_v30 = vrot.slane %v132_v29, 2 }
  0xb9   :  { %v134_v31 = vadd.f32 %v133_v30, %v132_v29 }
  0xbb   :  { %v135_v32 = vrot.slane %v134_v31, 1 }
  0xbd   :  { %v136_v34 = vadd.f32 %v135_v32, %v134_v31  ;;  %v224_v31 = vld [vmem:[%s431_s8] sm:$0x3] }
  0xbf   :  { %v137_v35 = vadd.f32 %v136_v34, %v121_v33 }
  0xc1   :  { %138 = vst [vmem:[#allocation2] sm:$0x1] %v137_v35  ;;  %v234_v35 = vld [vmem:[%s432_s9] sm:$0x3] }
  0xc8   :  { %v142_v38 = vld [vmem:[#allocation2] sm:$0x1] }
  0xc9   :  { %v144_v39 = vmul.f32 %v143_v36, %v142_v38 }
  0xcb   :  { %v153_v42 = vrot.slane %v144_v39, %v152_v37 }
  0xcd   :  { %v156_v43 = vmul.f32 %v153_v42, %v146_v40  ;;  %v155_v44 = vmul.f32 %v153_v42, %v145_v41  ;;  %v158_v47 = vmul.f32 %v153_v42, %v148_v45  ;;  %v157_v48 = vmul.f32 %v153_v42, %v147_v46 }
  0xcf   :  { %161 = vadd.xlane.f32.xlu0 %v156_v43  ;;  %159 = vadd.xlane.f32.xlu1 %v155_v44 }
  0xd3   :  { %165 = vadd.xlane.f32.xlu0 %v158_v47  ;;  %163 = vadd.xlane.f32.xlu1 %v157_v48 }
 0x158   :  { %v162_v52 = vpop.xlane.xlu0 %161  ;;  %v160_v53 = vpop.xlane.xlu1 %159 }
 0x159   :  { %v172_v54 = vadd.f32 %v168_v50, %v162_v52  ;;  %v171_v55 = vadd.f32 %v167_v51, %v160_v53 }
 0x15b   :  { %v176_v57 = vmax.f32 %v172_v54, 0.0  ;;  %v175_v58 = vmax.f32 %v171_v55, 0.0 }
 0x15c   :  { %v166_v60 = vpop.xlane.xlu0 %165  ;;  %v164_v61 = vpop.xlane.xlu1 %163 }
 0x15d   :  { %v173_v62 = vadd.f32 %v169_v56, %v164_v61  ;;  %190 = vperm.xlu0 %253, %v176_v57   ;;  %185 = vperm.xlu1 %252, %v175_v58   ;;  %v174_v63 = vadd.f32 %v170_v59, %v166_v60 }
 0x15f   :  { %v177_v0 = vmax.f32 %v173_v62, 0.0  ;;  %v178_v1 = vmax.f32 %v174_v63, 0.0 }
 0x161   :  { %195 = vperm.xlu1 %252, %v177_v0  }
 0x165   :  { %200 = vperm.xlu1 %252, %v178_v1  }
 0x1d8   :  { %v191_v4 = vpop.permute.xlu0 %190  ;;  %v186_v5 = vpop.permute.xlu1 %185 }
 0x1d9   :  { %v204_v6 = vmul.f32 %v191_v4, %v180_v2  ;;  %v203_v8 = vmul.f32 %v186_v5, %v179_v3 }
 0x1db   :  { %v209_v11 = vsel %vm207_vm15, %v204_v6, 0.0  ;;  %v208_v12 = vsel %vm207_vm15, %v203_v8, 0.0 }
 0x1dc   :  { %v196_v10 = vpop.permute.xlu1 %195  ;;  %v210_v16 = vadd.f32 %v209_v11, %v208_v12 }
 0x1dd   :  { %v205_v13 = vmul.f32 %v196_v10, %v181_v9 }
 0x1df   :  { %v211_v15 = vsel %vm207_vm15, %v205_v13, 0.0 }
 0x1e0   :  { %v201_v17 = vpop.permute.xlu1 %200  ;;  %v212_v19 = vadd.f32 %v211_v15, %v210_v16 }
 0x1e1   :  { %v206_v18 = vmul.f32 %v201_v17, %v182_v14 }
 0x1e3   :  { %v213_v20 = vsel %vm207_vm15, %v206_v18, 0.0 }
 0x1e4   :  { %v214_v21 = vadd.f32 %v213_v20, %v212_v19 }
 0x1e6   :  { %v215_v22 = vrot.slane %v214_v21, 4 }
 0x1e8   :  { %v216_v23 = vadd.f32 %v215_v22, %v214_v21 }
 0x1ea   :  { %v217_v24 = vrot.slane %v216_v23, 2 }
 0x1ec   :  { %v218_v25 = vadd.f32 %v217_v24, %v216_v23 }
 0x1ee   :  { %v219_v26 = vrot.slane %v218_v25, 1 }
 0x1f0   :  { %v220_v28 = vadd.f32 %v219_v26, %v218_v25 }
 0x1f2   :  { %v222_v29 = vadd.f32 %v221_v27, %v220_v28 }
 0x1f4   :  { %v223_v30 = vmax.f32 %v222_v29, 0.0 }
 0x1f6   :  { %v228_v32 = vrot.slane %v223_v30, %v152_v37 }
 0x1f8   :  { %v229_v33 = vmul.f32 %v228_v32, %v224_v31 }
 0x1fa   :  { %v231_v34 = vsel %vm230_vm0, %v229_v33, 0.0 }
 0x1fb   :  { %232 = vadd.xlane.f32.xlu1 %v231_v34 }
 0x284   :  { %v233_v36 = vpop.xlane.xlu1 %232 }
 0x285   :  { %v235_v38 = vadd.f32 %v234_v35, %v233_v36 }
 0x287   :  { %237 = vst.msk [vmem:[%s433_s10] sm:$0x3] %vm236_vm1, %v235_v38 }
 0x288   :  { %242 = vsyncpa [#allocation4], 1 }
 0x289   :  { %243 = vsyncpa [#allocation6], 1 }

</bundles_post_ra>
